<compile_context>
chip_gen: v7x
topology: tpu7x:2x2x1
jax: 0.10.0
libtpu: 0.0.40
codegen_flags: <defaults>
</compile_context>

<pallas_src>
import functools

import jax
import jax.numpy as jnp
from jax.experimental import pallas as pl
from jax.experimental.pallas import tpu as pltpu

# Model dims (from NLP2023MetaNetwork2.__init__ defaults)
RAW = 200        # raw_size
FEAT = 60        # feat_size
HID = 22         # hidden_size
NLAYERS_1 = 4
PRED_HID = 30
PACK = 128       # lane-padded width for packed weights / hidden activations


def _round_up(x, m):
    return (x + m - 1) // m * m


# ------------------------------------ kernel ------------------------------------------
def _meta_kernel(feats_ref, wf_ref, wr_ref, wh_ref, b_ref, out_ref, *, n_per_net):
    """One grid step scores TB networks (TB * n_per_net raw-feature rows)."""
    f32, bf16 = jnp.float32, jnp.bfloat16
    M = feats_ref.shape[0]
    N = n_per_net
    TB = M // N

    b = b_ref[...]                                   # (8, 128) f32 biases, zero-padded lanes
    x = feats_ref[...]                               # (M, 200) bf16

    # mlp_raw_to_feat -- bf16 operands on the MXU, f32 accumulation.
    # Hidden dims are zero-padded to 128 lanes; padded lanes stay exactly 0 through the
    # whole ReLU chain (zero weight columns + zero bias lanes), so no masking is needed.
    h = jnp.dot(x, wf_ref[...], preferred_element_type=f32) + b[0:1, :]
    h = jnp.maximum(h, 0.0).astype(bf16)
    h = jnp.dot(h, wr_ref[0], preferred_element_type=f32) + b[1:2, :]
    h = jnp.maximum(h, 0.0).astype(bf16)
    h = jnp.dot(h, wr_ref[1], preferred_element_type=f32) + b[2:3, :]
    h = jnp.maximum(h, 0.0).astype(bf16)
    h = jnp.dot(h, wr_ref[2], preferred_element_type=f32) + b[3:4, :]
    h = jnp.maximum(h, 0.0).astype(bf16)
    feat = jnp.dot(h, wr_ref[3], preferred_element_type=f32) + b[4:5, :]     # (M, 128) f32

    # intermediate(): per-network mean / unbiased std over the N feature rows (f32).
    # (N == 1 gives 0/0 = NaN, matching torch.std(dim=0, unbiased=True).)
    feat3 = feat.reshape(TB, N, PACK)                # f32 layout view (free when N % 8 == 0)
    mean = jnp.mean(feat3, axis=1)                   # (TB, 128)
    var = jnp.sum((feat3 - mean[:, None, :]) ** 2, axis=1) / (N - 1.0)
    std = jnp.sqrt(var)                              # (TB, 128)

    # mlp_feat_to_pred, first layer fused: cat([mean, std], -1) @ packed (256,128) weight.
    hc = jnp.concatenate([mean, std], axis=-1).astype(bf16)                  # (TB, 256)
    p = jnp.dot(hc, wh_ref[...], preferred_element_type=f32) + b[5:6, :]
    p = jnp.maximum(p, 0.0).astype(bf16)             # cols >= 30 are exactly 0
    p = jnp.dot(p, wr_ref[4], preferred_element_type=f32) + b[6:7, :]        # lane 0 = logit

    # Lane-dense (TB, 128) bf16 store (unmasked vst); wrapper slices lane 0.
    out_ref[...] = jax.nn.sigmoid(p).astype(out_ref.dtype)


# ------------------------------------ wrapper ------------------------------------------
def _pack_params(params):
    """Consolidate the 15 tiny weights/biases into 4 zero-padded slabs (bf16 W, f32 b)."""
    f32, bf16 = jnp.float32, jnp.bfloat16
    (w0, b0), (w1, b1), (w2, b2), (w3, b3), (w4, b4) = params["raw"]
    pw0, pb0 = params["pw0"], params["pb0"]
    pw1, pb1 = params["pw1"], params["pb1"]

    def pad_w(w):
        i, o = w.shape
        return jnp.zeros((PACK, PACK), f32).at[:i, :o].set(w.astype(f32))

    def pad_b(bias):
        v = bias.reshape(-1).astype(f32)
        return jnp.zeros((PACK,), f32).at[: v.shape[0]].set(v)

    w_first = jnp.zeros((RAW, PACK), f32).at[:, :HID].set(w0.astype(f32)).astype(bf16)
    w_rest = jnp.stack([pad_w(w1), pad_w(w2), pad_w(w3), pad_w(w4),
                        pad_w(pw1)]).astype(bf16)                         # (5, 128, 128)
    # Fused head weight: rows 0:60 act on mean, rows 128:188 act on std.
    w_head = (jnp.zeros((2 * PACK, PACK), f32)
              .at[:FEAT, :PRED_HID].set(pw0[:FEAT].astype(f32))
              .at[PACK:PACK + FEAT, :PRED_HID].set(pw0[FEAT:].astype(f32))
              .astype(bf16))                                               # (256, 128)
    b_all = jnp.stack([pad_b(b0), pad_b(b1), pad_b(b2), pad_b(b3), pad_b(b4),
                       pad_b(pb0), pad_b(pb1), jnp.zeros((PACK,), f32)])   # (8, 128) f32
    return w_first, w_rest, w_head, b_all


@functools.partial(jax.jit, static_argnames=("tile_b",))
def meta_network_forward(feats, params, tile_b=None):
    """feats: (B, N, RAW) float  ->  (B, 1) float32 Trojan scores."""
    B, N, raw = feats.shape
    assert raw == RAW

    # TB networks per grid step.  Default 512/step fits every chip's VMEM at bf16 with the
    # explicit 64 MiB scoped limit below; TB is also capped at ~ceil(B/2) (floor 64/step)
    # so big batches always produce >=2 "parallel" steps (shards across v7x's 2 TCs).
    if tile_b is None:
        tile_b = 512
    tile_b = max(8, _round_up(int(tile_b), 8))
    half_b = max(64, _round_up(pl.cdiv(B, 2), 8))
    TB = min(tile_b, half_b, _round_up(B, 8))
    B_pad = _round_up(B, TB)
    G = B_pad // TB

    # bf16 feats: halves the dominant HBM read and feeds the MXU at bf16 rate.
    feats = feats.astype(jnp.bfloat16)
    if B_pad != B:
        feats = jnp.pad(feats, ((0, B_pad - B), (0, 0), (0, 0)))
    feats2d = feats.reshape(B_pad * N, RAW)          # pre-reshape: no in-kernel relayout

    w_first, w_rest, w_head, b_all = _pack_params(params)

    flops = B_pad * (2 * N * (RAW * PACK + 4 * PACK * PACK)
                     + 2 * (2 * PACK * PACK + PACK * PACK))
    bytes_accessed = (2 * B_pad * N * RAW                                  # bf16 feats
                      + 2 * (RAW * PACK + 5 * PACK * PACK + 2 * PACK * PACK)  # bf16 weights
                      + 4 * 8 * PACK                                       # f32 biases
                      + 2 * B_pad * PACK)                                  # bf16 output
    cost = pl.CostEstimate(flops=flops, transcendentals=B_pad * 2 * PACK,
                           bytes_accessed=bytes_accessed)

    const_w = dict(pipeline_mode=pl.Buffered(1))     # weight slabs: same block every step

    out = pl.pallas_call(
        functools.partial(_meta_kernel, n_per_net=N),
        out_shape=jax.ShapeDtypeStruct((B_pad, PACK), jnp.bfloat16),
        grid_spec=pltpu.PrefetchScalarGridSpec(
            num_scalar_prefetch=0,
            grid=(G,),
            in_specs=[
                pl.BlockSpec((TB * N, RAW), lambda g: (g, 0)),               # feats tile
                pl.BlockSpec((RAW, PACK), lambda g: (0, 0), **const_w),      # layer-1 W
                pl.BlockSpec((5, PACK, PACK), lambda g: (0, 0, 0), **const_w),  # Ws 2..5 + out
                pl.BlockSpec((2 * PACK, PACK), lambda g: (0, 0), **const_w),    # fused head W
                pl.BlockSpec((8, PACK), lambda g: (0, 0), **const_w),        # all biases
            ],
            out_specs=pl.BlockSpec((TB, PACK), lambda g: (g, 0)),
        ),
        compiler_params=pltpu.CompilerParams(
            dimension_semantics=("parallel",),       # distinct output block per step
            vmem_limit_bytes=64 * 1024 * 1024,       # covers v5e's 16 MiB default limit
        ),
        cost_estimate=cost,
    )(feats2d, w_first, w_rest, w_head, b_all)

    return out[:B, 0:1].astype(jnp.float32)          # score lives in lane 0


# --------------------------- parameter init (deterministic) ---------------------------
def _linear_init(key, in_dim, out_dim):
    kw, kb = jax.random.split(key)
    bound = 1.0 / (in_dim ** 0.5)            # matches torch nn.Linear default init range
    w = jax.random.uniform(kw, (in_dim, out_dim), jnp.float32, -bound, bound)
    b = jax.random.uniform(kb, (1, out_dim), jnp.float32, -bound, bound)
    return w, b


def init_params(key):
    dims = [RAW] + [HID] * NLAYERS_1 + [FEAT]           # 200,22,22,22,22,60
    keys = jax.random.split(key, (len(dims) - 1) + 2)
    raw = [_linear_init(keys[i], dims[i], dims[i + 1]) for i in range(len(dims) - 1)]
    pw0, pb0 = _linear_init(keys[-2], 2 * FEAT, PRED_HID)
    pw1, pb1 = _linear_init(keys[-1], PRED_HID, 1)
    return {"raw": raw, "pw0": pw0, "pb0": pb0, "pw1": pw1, "pb1": pb1}


# --------------------------- pure-JAX reference (for validation) ----------------------
def ref_forward(feats, params):
    outs = []
    for b in range(feats.shape[0]):
        h = feats[b]
        for w, bias in params["raw"][:-1]:
            h = jnp.maximum(h @ w + bias, 0.0)
        w, bias = params["raw"][-1]
        f = h @ w + bias
        mean = jnp.mean(f, axis=0, keepdims=True)
        std = jnp.std(f, axis=0, keepdims=True, ddof=1)   # torch.std default: unbiased
        hc = jnp.concatenate([mean, std], axis=1)
        p = jnp.maximum(hc @ params["pw0"] + params["pb0"], 0.0)
        p = p @ params["pw1"] + params["pb1"]
        outs.append(jax.nn.sigmoid(p))
    return jnp.concatenate(outs, axis=0)


if __name__ == "__main__":
    key = jax.random.PRNGKey(0)
    k_param, k_data = jax.random.split(key)
    params = init_params(k_param)

    # x in the torch module is a list of dicts; here: B elements, each with an
    # (N=8, 200) 'feats' tensor and a scalar 'reward'.
    # TODO(synk): torch forward stacks `rewards` but never uses them in the output.
    B, N = 2, 8
    kf, kr = jax.random.split(k_data)
    feats = jax.random.normal(kf, (B, N, RAW), dtype=jnp.float32)
    rewards = jax.random.normal(kr, (B,), dtype=jnp.float32)  # unused, mirrors torch forward

    out = jax.block_until_ready(meta_network_forward(feats, params))
    ref = jax.block_until_ready(ref_forward(feats, params))
    assert out.shape == (B, 1)
    # bf16 matmul chain + bf16 output slab -> compare post-sigmoid scores at 1e-2.
    assert jnp.allclose(out, ref, atol=1e-2, rtol=0.0), (out, ref)

    # Exercise the padded / multi-step-grid path as well (B not a multiple of TB).
    B2 = 20
    feats2 = jax.random.normal(jax.random.PRNGKey(1), (B2, N, RAW), dtype=jnp.float32)
    out2 = jax.block_until_ready(meta_network_forward(feats2, params, tile_b=8))
    ref2 = jax.block_until_ready(ref_forward(feats2, params))
    assert out2.shape == (B2, 1)
    assert jnp.allclose(out2, ref2, atol=1e-2, rtol=0.0), (out2, ref2)

    print("KERNEL_OK")
</pallas_src>

<mosaic_0001>
module attributes {stable_mosaic.version = 11 : i64} {
  func.func @_meta_kernel(%arg0: i32, %arg1: memref<64x200xbf16, #tpu.memory_space<vmem>>, %arg2: memref<200x128xbf16, #tpu.memory_space<vmem>>, %arg3: memref<5x128x128xbf16, #tpu.memory_space<vmem>>, %arg4: memref<256x128xbf16, #tpu.memory_space<vmem>>, %arg5: memref<8x128xf32, #tpu.memory_space<vmem>>, %arg6: memref<8x128xbf16, #tpu.memory_space<vmem>>) attributes {dimension_semantics = [#tpu.dimension_semantics<parallel>], iteration_bounds = array<i64: 1>, scalar_prefetch = 0 : i64, scratch_operands = 0 : i64, tpu.core_type = #tpu.core_type<tc>, window_params = [{transform_indices = @transform_0, window_bounds = array<i64: 64, 200>}, {pipeline_mode = #tpu.pipeline_mode<synchronous>, transform_indices = @transform_1, window_bounds = array<i64: 200, 128>}, {pipeline_mode = #tpu.pipeline_mode<synchronous>, transform_indices = @transform_2, window_bounds = array<i64: 5, 128, 128>}, {pipeline_mode = #tpu.pipeline_mode<synchronous>, transform_indices = @transform_3, window_bounds = array<i64: 256, 128>}, {pipeline_mode = #tpu.pipeline_mode<synchronous>, transform_indices = @transform_4, window_bounds = array<i64: 8, 128>}, {transform_indices = @transform_5, window_bounds = array<i64: 8, 128>}]} {
    %c0 = arith.constant 0 : index
    %c0_0 = arith.constant 0 : index
    %0 = vector.load %arg5[%c0, %c0_0] : memref<8x128xf32, #tpu.memory_space<vmem>>, vector<8x128xf32>
    %c0_1 = arith.constant 0 : index
    %c0_2 = arith.constant 0 : index
    %1 = vector.load %arg1[%c0_1, %c0_2] : memref<64x200xbf16, #tpu.memory_space<vmem>>, vector<64x200xbf16>
    %c0_3 = arith.constant 0 : index
    %c0_4 = arith.constant 0 : index
    %2 = vector.load %arg2[%c0_3, %c0_4] : memref<200x128xbf16, #tpu.memory_space<vmem>>, vector<200x128xbf16>
    %cst = arith.constant dense<0.000000e+00> : vector<64x128xf32>
    %3 = tpu.matmul %1, %2, %cst {dimension_numbers = #tpu.dot_dimension_numbers<[1], [0], [0], [1], [0, 0, 1, 1], [], []>} : vector<64x200xbf16>, vector<200x128xbf16>, vector<64x128xf32> -> vector<64x128xf32>
    %4 = vector.extract_strided_slice %0 {offsets = [0, 0], sizes = [1, 128], strides = [1, 1]} : vector<8x128xf32> to vector<1x128xf32>
    %5 = vector.broadcast %4 : vector<1x128xf32> to vector<64x128xf32>
    %6 = arith.addf %3, %5 : vector<64x128xf32>
    %cst_5 = arith.constant 0.000000e+00 : f32
    %7 = vector.broadcast %cst_5 : f32 to vector<64x128xf32>
    %8 = arith.maximumf %6, %7 : vector<64x128xf32>
    %9 = arith.truncf %8 : vector<64x128xf32> to vector<64x128xbf16>
    %c0_6 = arith.constant 0 : index
    %c0_7 = arith.constant 0 : index
    %c0_8 = arith.constant 0 : index
    %10 = vector.load %arg3[%c0_6, %c0_7, %c0_8] : memref<5x128x128xbf16, #tpu.memory_space<vmem>>, vector<1x128x128xbf16>
    %11 = vector.shape_cast %10 : vector<1x128x128xbf16> to vector<128x128xbf16>
    %cst_9 = arith.constant dense<0.000000e+00> : vector<64x128xf32>
    %12 = tpu.matmul %9, %11, %cst_9 {dimension_numbers = #tpu.dot_dimension_numbers<[1], [0], [0], [1], [0, 0, 1, 1], [], []>} : vector<64x128xbf16>, vector<128x128xbf16>, vector<64x128xf32> -> vector<64x128xf32>
    %13 = vector.extract_strided_slice %0 {offsets = [1, 0], sizes = [1, 128], strides = [1, 1]} : vector<8x128xf32> to vector<1x128xf32>
    %14 = vector.broadcast %13 : vector<1x128xf32> to vector<64x128xf32>
    %15 = arith.addf %12, %14 : vector<64x128xf32>
    %cst_10 = arith.constant 0.000000e+00 : f32
    %16 = vector.broadcast %cst_10 : f32 to vector<64x128xf32>
    %17 = arith.maximumf %15, %16 : vector<64x128xf32>
    %18 = arith.truncf %17 : vector<64x128xf32> to vector<64x128xbf16>
    %c1 = arith.constant 1 : index
    %c0_11 = arith.constant 0 : index
    %c0_12 = arith.constant 0 : index
    %19 = vector.load %arg3[%c1, %c0_11, %c0_12] : memref<5x128x128xbf16, #tpu.memory_space<vmem>>, vector<1x128x128xbf16>
    %20 = vector.shape_cast %19 : vector<1x128x128xbf16> to vector<128x128xbf16>
    %cst_13 = arith.constant dense<0.000000e+00> : vector<64x128xf32>
    %21 = tpu.matmul %18, %20, %cst_13 {dimension_numbers = #tpu.dot_dimension_numbers<[1], [0], [0], [1], [0, 0, 1, 1], [], []>} : vector<64x128xbf16>, vector<128x128xbf16>, vector<64x128xf32> -> vector<64x128xf32>
    %22 = vector.extract_strided_slice %0 {offsets = [2, 0], sizes = [1, 128], strides = [1, 1]} : vector<8x128xf32> to vector<1x128xf32>
    %23 = vector.broadcast %22 : vector<1x128xf32> to vector<64x128xf32>
    %24 = arith.addf %21, %23 : vector<64x128xf32>
    %cst_14 = arith.constant 0.000000e+00 : f32
    %25 = vector.broadcast %cst_14 : f32 to vector<64x128xf32>
    %26 = arith.maximumf %24, %25 : vector<64x128xf32>
    %27 = arith.truncf %26 : vector<64x128xf32> to vector<64x128xbf16>
    %c2 = arith.constant 2 : index
    %c0_15 = arith.constant 0 : index
    %c0_16 = arith.constant 0 : index
    %28 = vector.load %arg3[%c2, %c0_15, %c0_16] : memref<5x128x128xbf16, #tpu.memory_space<vmem>>, vector<1x128x128xbf16>
    %29 = vector.shape_cast %28 : vector<1x128x128xbf16> to vector<128x128xbf16>
    %cst_17 = arith.constant dense<0.000000e+00> : vector<64x128xf32>
    %30 = tpu.matmul %27, %29, %cst_17 {dimension_numbers = #tpu.dot_dimension_numbers<[1], [0], [0], [1], [0, 0, 1, 1], [], []>} : vector<64x128xbf16>, vector<128x128xbf16>, vector<64x128xf32> -> vector<64x128xf32>
    %31 = vector.extract_strided_slice %0 {offsets = [3, 0], sizes = [1, 128], strides = [1, 1]} : vector<8x128xf32> to vector<1x128xf32>
    %32 = vector.broadcast %31 : vector<1x128xf32> to vector<64x128xf32>
    %33 = arith.addf %30, %32 : vector<64x128xf32>
    %cst_18 = arith.constant 0.000000e+00 : f32
    %34 = vector.broadcast %cst_18 : f32 to vector<64x128xf32>
    %35 = arith.maximumf %33, %34 : vector<64x128xf32>
    %36 = arith.truncf %35 : vector<64x128xf32> to vector<64x128xbf16>
    %c3 = arith.constant 3 : index
    %c0_19 = arith.constant 0 : index
    %c0_20 = arith.constant 0 : index
    %37 = vector.load %arg3[%c3, %c0_19, %c0_20] : memref<5x128x128xbf16, #tpu.memory_space<vmem>>, vector<1x128x128xbf16>
    %38 = vector.shape_cast %37 : vector<1x128x128xbf16> to vector<128x128xbf16>
    %cst_21 = arith.constant dense<0.000000e+00> : vector<64x128xf32>
    %39 = tpu.matmul %36, %38, %cst_21 {dimension_numbers = #tpu.dot_dimension_numbers<[1], [0], [0], [1], [0, 0, 1, 1], [], []>} : vector<64x128xbf16>, vector<128x128xbf16>, vector<64x128xf32> -> vector<64x128xf32>
    %40 = vector.extract_strided_slice %0 {offsets = [4, 0], sizes = [1, 128], strides = [1, 1]} : vector<8x128xf32> to vector<1x128xf32>
    %41 = vector.broadcast %40 : vector<1x128xf32> to vector<64x128xf32>
    %42 = arith.addf %39, %41 : vector<64x128xf32>
    %43 = vector.shape_cast %42 : vector<64x128xf32> to vector<8x8x128xf32>
    %cst_22 = arith.constant dense<0.000000e+00> : vector<8x128xf32>
    %44 = vector.multi_reduction <add>, %43, %cst_22 [1] : vector<8x8x128xf32> to vector<8x128xf32>
    %cst_23 = arith.constant 8.000000e+00 : f32
    %45 = vector.broadcast %cst_23 : f32 to vector<8x128xf32>
    %46 = arith.divf %44, %45 : vector<8x128xf32>
    %47 = vector.shape_cast %46 : vector<8x128xf32> to vector<8x1x128xf32>
    %48 = vector.broadcast %47 : vector<8x1x128xf32> to vector<8x8x128xf32>
    %49 = arith.subf %43, %48 : vector<8x8x128xf32>
    %50 = arith.mulf %49, %49 : vector<8x8x128xf32>
    %cst_24 = arith.constant dense<0.000000e+00> : vector<8x128xf32>
    %51 = vector.multi_reduction <add>, %50, %cst_24 [1] : vector<8x8x128xf32> to vector<8x128xf32>
    %cst_25 = arith.constant 7.000000e+00 : f32
    %52 = vector.broadcast %cst_25 : f32 to vector<8x128xf32>
    %53 = arith.divf %51, %52 : vector<8x128xf32>
    %54 = math.sqrt %53 : vector<8x128xf32>
    %55 = tpu.concatenate %46, %54 in 1 : vector<8x128xf32>, vector<8x128xf32> -> vector<8x256xf32>
    %56 = arith.truncf %55 : vector<8x256xf32> to vector<8x256xbf16>
    %c0_26 = arith.constant 0 : index
    %c0_27 = arith.constant 0 : index
    %57 = vector.load %arg4[%c0_26, %c0_27] : memref<256x128xbf16, #tpu.memory_space<vmem>>, vector<256x128xbf16>
    %cst_28 = arith.constant dense<0.000000e+00> : vector<8x128xf32>
    %58 = tpu.matmul %56, %57, %cst_28 {dimension_numbers = #tpu.dot_dimension_numbers<[1], [0], [0], [1], [0, 0, 1, 1], [], []>} : vector<8x256xbf16>, vector<256x128xbf16>, vector<8x128xf32> -> vector<8x128xf32>
    %59 = vector.extract_strided_slice %0 {offsets = [5, 0], sizes = [1, 128], strides = [1, 1]} : vector<8x128xf32> to vector<1x128xf32>
    %60 = vector.broadcast %59 : vector<1x128xf32> to vector<8x128xf32>
    %61 = arith.addf %58, %60 : vector<8x128xf32>
    %cst_29 = arith.constant 0.000000e+00 : f32
    %62 = vector.broadcast %cst_29 : f32 to vector<8x128xf32>
    %63 = arith.maximumf %61, %62 : vector<8x128xf32>
    %64 = arith.truncf %63 : vector<8x128xf32> to vector<8x128xbf16>
    %c4 = arith.constant 4 : index
    %c0_30 = arith.constant 0 : index
    %c0_31 = arith.constant 0 : index
    %65 = vector.load %arg3[%c4, %c0_30, %c0_31] : memref<5x128x128xbf16, #tpu.memory_space<vmem>>, vector<1x128x128xbf16>
    %66 = vector.shape_cast %65 : vector<1x128x128xbf16> to vector<128x128xbf16>
    %cst_32 = arith.constant dense<0.000000e+00> : vector<8x128xf32>
    %67 = tpu.matmul %64, %66, %cst_32 {dimension_numbers = #tpu.dot_dimension_numbers<[1], [0], [0], [1], [0, 0, 1, 1], [], []>} : vector<8x128xbf16>, vector<128x128xbf16>, vector<8x128xf32> -> vector<8x128xf32>
    %68 = vector.extract_strided_slice %0 {offsets = [6, 0], sizes = [1, 128], strides = [1, 1]} : vector<8x128xf32> to vector<1x128xf32>
    %69 = vector.broadcast %68 : vector<1x128xf32> to vector<8x128xf32>
    %70 = arith.addf %67, %69 : vector<8x128xf32>
    %71 = arith.negf %70 : vector<8x128xf32>
    %72 = math.exp %71 : vector<8x128xf32>
    %cst_33 = arith.constant 1.000000e+00 : f32
    %73 = vector.broadcast %cst_33 : f32 to vector<8x128xf32>
    %74 = arith.addf %73, %72 : vector<8x128xf32>
    %75 = arith.divf %73, %74 : vector<8x128xf32>
    %76 = arith.truncf %75 : vector<8x128xf32> to vector<8x128xbf16>
    %c0_34 = arith.constant 0 : index
    %c0_35 = arith.constant 0 : index
    %77 = vector.load %arg6[%c0_34, %c0_35] : memref<8x128xbf16, #tpu.memory_space<vmem>>, vector<8x128xbf16>
    tpu.vector_store %arg6[%c0_34, %c0_35], %76 {strides = array<i32>} : memref<8x128xbf16, #tpu.memory_space<vmem>>, vector<8x128xbf16>,
    return
  }
  func.func @transform_0(%arg0: i32) -> (i32, i32) {
    %c0_i32 = arith.constant 0 : i32
    %c0_i32_0 = arith.constant 0 : i32
    return %arg0, %c0_i32 : i32, i32
  }
  func.func @transform_1(%arg0: i32) -> (i32, i32) {
    %c0_i32 = arith.constant 0 : i32
    %c0_i32_0 = arith.constant 0 : i32
    %c0_i32_1 = arith.constant 0 : i32
    return %c0_i32, %c0_i32_0 : i32, i32
  }
  func.func @transform_2(%arg0: i32) -> (i32, i32, i32) {
    %c0_i32 = arith.constant 0 : i32
    %c0_i32_0 = arith.constant 0 : i32
    %c0_i32_1 = arith.constant 0 : i32
    %c0_i32_2 = arith.constant 0 : i32
    return %c0_i32, %c0_i32_0, %c0_i32_1 : i32, i32, i32
  }
  func.func @transform_3(%arg0: i32) -> (i32, i32) {
    %c0_i32 = arith.constant 0 : i32
    %c0_i32_0 = arith.constant 0 : i32
    %c0_i32_1 = arith.constant 0 : i32
    return %c0_i32, %c0_i32_0 : i32, i32
  }
  func.func @transform_4(%arg0: i32) -> (i32, i32) {
    %c0_i32 = arith.constant 0 : i32
    %c0_i32_0 = arith.constant 0 : i32
    %c0_i32_1 = arith.constant 0 : i32
    return %c0_i32, %c0_i32_0 : i32, i32
  }
  func.func @transform_5(%arg0: i32) -> (i32, i32) {
    %c0_i32 = arith.constant 0 : i32
    %c0_i32_0 = arith.constant 0 : i32
    return %arg0, %c0_i32 : i32, i32
  }
}

</mosaic_0001>

<bundles_post_ra>
// kernel: meta_network_forward.1
= control target key start
LH: loop header
LB: loop body
LE: loop exit
PB: predicated region body
PF: predicated region fallthrough
CT: control target
= control target key end

     0   :  { %10 = vsyncpa [#allocation3], 0  ;;  %s2191_s0 = inlined_call_operand.hbm [shape: bf16[64,200], index: 0, kind: input, shape index: {}]   ;;  %s2192_s1 = inlined_call_operand.hbm [shape: bf16[200,128], index: 1, kind: input, shape index: {}]   ;;  %s2193_s2 = inlined_call_operand.hbm [shape: bf16[5,128,128], index: 2, kind: input, shape index: {}]   ;;  %s2194_s3 = inlined_call_operand.hbm [shape: bf16[256,128], index: 3, kind: input, shape index: {}]   ;;  %s2195_s4 = inlined_call_operand.hbm [shape: f32[8,128], index: 4, kind: input, shape index: {}]   ;;  %s2196_s5 = inlined_call_operand.hbm [shape: bf16[8,128], index: 5, kind: output, shape index: {}]  }
   0x1   :  { %11 = vsyncpa [#allocation6], 0 }
   0x2   :  { %12 = vsyncpa [#allocation9], 0 }
   0x3   :  { %13 = vsyncpa [#allocation4], 0  ;;  %s1969_s18 = smov [#allocation5]   ;;  %s1829_s22 = scalar_lea.hbm %s2192_s1, 1600 }
   0x4   :  { %s31_s19 = sshll.u32 %s1969_s18, 4  ;;  %p1830_p0 = scmp.ne.s32.totalorder %s2192_s1, %s1829_s22  ;;  %s32_s19 = int_to_ptr.vmem [resolvable:$true] %s31_s19 }
   0x5   :  { %p1833_p1 = scmp.lt.u32.totalorder %s1829_s22, %s2192_s1 }
   0x7   :  { %p1835_p2 = pnand %p1833_p1, %p1830_p0 }
   0x9   :  { %1838 = shalt.err (!%p1835_p2)
}
   0xa   :  { %s1839_s27 = scalar_lea.vmem %s32_s19, 1600  ;;  %p1844_p4 = scmp.lt.s32.totalorder %s32_s19, %s32_s19 }
   0xb   :  { %p1840_p3 = scmp.ne.s32.totalorder %s32_s19, %s1839_s27  ;;  %p1845_p5 = scmp.lt.s32.totalorder %s1839_s27, %s1839_s27 }
   0xd   :  { %p1846_p6 = por %p1845_p5, %p1844_p4 }
   0xf   :  { %p1847_p7 = pnand %p1846_p6, %p1840_p3 }
  0x11   :  { %1850 = shalt.err (!%p1847_p7)
}
  0x12   :  { %s1970_s28 = smov 64   ;;  %s1971_s29 = smov 4  }
  0x13   :  { %37 = dma.hbm_to_vmem [thread:$0]  %s2192_s1, 1600, %s32_s19, [#allocation6], %s1970_s28, %s1970_s28, %s1971_s29  }
  0x14   :  { %s1972_s7 = smov [#allocation8]   ;;  %s1973_s9 = smov [#allocation2]  }
  0x15   :  { %s55_s8 = sshll.u32 %s1972_s7, 4  ;;  %s19_s10 = sshll.u32 %s1973_s9, 4  ;;  %s56_s8 = int_to_ptr.vmem [resolvable:$true] %s55_s8  ;;  %s20_s10 = int_to_ptr.vmem [resolvable:$true] %s19_s10 }
  0x16   :  { %s1851_s13 = scalar_lea.hbm %s2194_s3, 2048 }
  0x17   :  { %p1852_p8 = scmp.ne.s32.totalorder %s2194_s3, %s1851_s13  ;;  %p1855_p9 = scmp.lt.u32.totalorder %s1851_s13, %s2194_s3 }
  0x19   :  { %p1857_p10 = pnand %p1855_p9, %p1852_p8 }
  0x1b   :  { %1860 = shalt.err (!%p1857_p10)
}
  0x1c   :  { %s1861_s1 = scalar_lea.vmem %s56_s8, 2048  ;;  %p1866_p12 = scmp.lt.s32.totalorder %s56_s8, %s56_s8 }
  0x1d   :  { %p1862_p11 = scmp.ne.s32.totalorder %s56_s8, %s1861_s1  ;;  %p1867_p13 = scmp.lt.s32.totalorder %s1861_s1, %s1861_s1 }
  0x1f   :  { %p1868_p0 = por %p1867_p13, %p1866_p12 }
  0x21   :  { %p1869_p1 = pnand %p1868_p0, %p1862_p11 }
  0x23   :  { %1872 = shalt.err (!%p1869_p1)
}
  0x24   :  { %61 = dma.hbm_to_vmem [thread:$0]  %s2194_s3, 2048, %s56_s8, [#allocation9], %s1970_s28, %s1970_s28, %s1971_s29  }
  0x25   :  { %s1873_s22 = scalar_lea.hbm %s2191_s0, 1024 }
  0x26   :  { %p1874_p2 = scmp.ne.s32.totalorder %s2191_s0, %s1873_s22  ;;  %p1877_p3 = scmp.lt.u32.totalorder %s1873_s22, %s2191_s0 }
  0x28   :  { %p1879_p4 = pnand %p1877_p3, %p1874_p2 }
  0x2a   :  { %1882 = shalt.err (!%p1879_p4)
}
  0x2b   :  { %s1883_s27 = scalar_lea.vmem %s20_s10, 1024  ;;  %p1888_p6 = scmp.lt.s32.totalorder %s20_s10, %s20_s10 }
  0x2c   :  { %p1884_p5 = scmp.ne.s32.totalorder %s20_s10, %s1883_s27  ;;  %p1889_p7 = scmp.lt.s32.totalorder %s1883_s27, %s1883_s27 }
  0x2e   :  { %p1890_p8 = por %p1889_p7, %p1888_p6 }
  0x30   :  { %p1891_p9 = pnand %p1890_p8, %p1884_p5 }
  0x32   :  { %1894 = shalt.err (!%p1891_p9)
}
  0x33   :  { %s1974_s3 = smov 128   ;;  %s1975_s30 = smov 8  }
  0x34   :  { %25 = dma.hbm_to_vmem [thread:$0]  %s2191_s0, 1024, %s20_s10, [#allocation3], %s1974_s3, %s1974_s3, %s1975_s30  }
  0x35   :  { %s1976_s8 = smov [#allocation7]   ;;  %s1977_s11 = smov [#allocation10]  }
  0x36   :  { %s43_s9 = sshll.u32 %s1976_s8, 4  ;;  %s68_s12 = sshll.u32 %s1977_s11, 4  ;;  %s44_s9 = int_to_ptr.vmem [resolvable:$true] %s43_s9  ;;  %s69_s12 = int_to_ptr.vmem [resolvable:$true] %s68_s12 }
  0x37   :  { %s1895_s15 = scalar_lea.hbm %s2193_s2, 5120 }
  0x38   :  { %p1896_p10 = scmp.ne.s32.totalorder %s2193_s2, %s1895_s15  ;;  %p1899_p11 = scmp.lt.u32.totalorder %s1895_s15, %s2193_s2 }
  0x3a   :  { %p1901_p12 = pnand %p1899_p11, %p1896_p10 }
  0x3c   :  { %1904 = shalt.err (!%p1901_p12)
}
  0x3d   :  { %s1905_s0 = scalar_lea.vmem %s44_s9, 5120  ;;  %p1910_p0 = scmp.lt.s32.totalorder %s44_s9, %s44_s9 }
  0x3e   :  { %p1906_p13 = scmp.ne.s32.totalorder %s44_s9, %s1905_s0  ;;  %p1911_p1 = scmp.lt.s32.totalorder %s1905_s0, %s1905_s0 }
  0x40   :  { %p1912_p2 = por %p1911_p1, %p1910_p0 }
  0x42   :  { %p1913_p3 = pnand %p1912_p2, %p1906_p13 }
  0x44   :  { %1916 = shalt.err (!%p1913_p3)
}
  0x45   :  { %49 = dma.hbm_to_vmem [thread:$0]  %s2193_s2, 5120, %s44_s9, [#allocation6], %s1970_s28, %s1970_s28, %s1971_s29  }
  0x46   :  { %s1917_s22 = scalar_lea.hbm %s2195_s4, 128 }
  0x47   :  { %p1918_p4 = scmp.ne.s32.totalorder %s2195_s4, %s1917_s22  ;;  %p1921_p5 = scmp.lt.u32.totalorder %s1917_s22, %s2195_s4 }
  0x49   :  { %p1923_p6 = pnand %p1921_p5, %p1918_p4 }
  0x4b   :  { %1926 = shalt.err (!%p1923_p6)
}
  0x4c   :  { %s1927_s27 = scalar_lea.vmem %s69_s12, 128  ;;  %p1932_p8 = scmp.lt.s32.totalorder %s69_s12, %s69_s12 }
  0x4d   :  { %p1928_p7 = scmp.ne.s32.totalorder %s69_s12, %s1927_s27  ;;  %p1933_p9 = scmp.lt.s32.totalorder %s1927_s27, %s1927_s27 }
  0x4f   :  { %p1934_p10 = por %p1933_p9, %p1932_p8 }
  0x51   :  { %p1935_p11 = pnand %p1934_p10, %p1928_p7 }
  0x53   :  { %1938 = shalt.err (!%p1935_p11)
}
  0x54   :  { %71 = dma.hbm_to_vmem [thread:$0]  %s2195_s4, 128, %s69_s12, [#allocation9]  }
  0x55   :  { %1961 = dma.done.wait [#allocation3], 1024  }
  0x56   :  { %1962 = vsyncadd [#allocation3], 4294966272 }
  0x57   :  { %1963 = dma.done.wait [#allocation6], 6720  }
  0x58   :  { %1964 = vsyncadd [#allocation6], 4294960576 }
  0x59   :  { %1965 = dma.done.wait [#allocation9], 2176  }
  0x5a   :  { %1966 = vsyncadd [#allocation9], 4294965120  ;;  %v1978_v0 = vmov 0   ;;  %v1727_v1 = vld [vmem:[#allocation5] sm:$0xff]   ;;  %v1728_v2 = vld [vmem:[#allocation5 + $0x8] sm:$0xff]   ;;  %vm237_vm0 = vcmask 588800   ;;  %v122_v32 = vlaneseq }
  0x5b   :  { %254 = vmatprep.subr.bf16.mxu0 %v1978_v0  ;;  %v1729_v3 = vld [vmem:[#allocation5 + $0x10] sm:$0xff]   ;;  %v1730_v4 = vld [vmem:[#allocation5 + $0x18] sm:$0xff]   ;;  %v1742_v5 = vld [vmem:[#allocation2 + $0x4] ss:$8 sps:$4 sm:$0xff]   ;;  %vm250_vm1 = vcmask 1043456   ;;  %vm1096_vm2 = vcmask 1041409  }
  0x5c   :  { %255 = vmatpush1.bf16.msra.mxu0 %v1727_v1  ;;  %v1731_v6 = vld [vmem:[#allocation5 + $0x20] sm:$0xff]   ;;  %1458 = vmatprep.mubr.msk.bf16.mxu0 %vm237_vm0, %v1742_v5  ;;  %v1732_v7 = vld [vmem:[#allocation5 + $0x28] sm:$0xff]   ;;  %v1733_v11 = vld [vmem:[#allocation5 + $0x30] sm:$0xff]   ;;  %v2085_v33 = vshrl.u32 %v122_v32, 7  ;;  %vm1098_vm3 = vcmask 1042434   ;;  %vm1100_vm4 = vcmask 1043459  }
  0x5d   :  { %256 = vmatprep.subr.bf16.mxu0 %v1978_v0  ;;  %v1739_v8 = vld [vmem:[#allocation5 + $0x60] ss:$0 sps:$4 sm:$0xff]   ;;  %v1752_v9 = vld [vmem:[#allocation7] sm:$0xff]   ;;  %v1753_v10 = vld [vmem:[#allocation7 + $0x8] sm:$0xff]   ;;  %vm1102_vm5 = vcmask 1044484   ;;  %vm1104_vm6 = vcmask 1045509  }
  0x5e   :  { %1598 = vmatprep.subr.bf16.mxu1 %v1752_v9  ;;  %v252_v12 = vsel %vm250_vm1, %v1739_v8, 0  ;;  %v1754_v13 = vld [vmem:[#allocation7 + $0x10] sm:$0xff]   ;;  %v1755_v15 = vld [vmem:[#allocation7 + $0x18] sm:$0xff]   ;;  %v1736_v17 = vld [vmem:[#allocation5 + $0x48] sm:$0xff]   ;;  %v124_v34 = vsub.s32 0, %v2085_v33  ;;  %vm1106_vm7 = vcmask 1046534  }
  0x5f   :  { %1599 = vmatpush3.bf16.msra.mxu1 %v1752_v9  ;;  %v1734_v14 = vld [vmem:[#allocation5 + $0x38] sm:$0xff]   ;;  %v1735_v16 = vld [vmem:[#allocation5 + $0x40] sm:$0xff]   ;;  %v1737_v18 = vld [vmem:[#allocation5 + $0x50] sm:$0xff]   ;;  %vm1108_vm10 = vcmask 1047559   ;;  %s1981_s4 = smov [#allocation11]  }
  0x60   :  { %257 = vmatpush1.bf16.msra.mxu0 %v1728_v2  ;;  %1600 = vmatprep.subr.bf16.mxu1 %v1753_v10  ;;  %v1738_v19 = vld [vmem:[#allocation5 + $0x58] sm:$0xff]   ;;  %v1740_v20 = vld [vmem:[#allocation2] ss:$8 sps:$4 sm:$0xff]   ;;  %v1746_v23 = vld [vmem:[#allocation2 + $0x24] ss:$8 sps:$4 sm:$0xff]   ;;  %s1426_s29 = sshll.u32 %s1981_s4, 4  ;;  %s1427_s29 = int_to_ptr.vmem [resolvable:$true] %s1426_s29 }
  0x61   :  { %258 = vmatprep.subr.bf16.mxu0 %v1978_v0  ;;  %v1743_v21 = vld [vmem:[#allocation2 + $0x14] ss:$8 sps:$4 sm:$0xff]   ;;  %v1745_v22 = vld [vmem:[#allocation2 + $0x10] ss:$8 sps:$4 sm:$0xff]   ;;  %v1748_v24 = vld [vmem:[#allocation2 + $0x20] ss:$8 sps:$4 sm:$0xff]   ;;  %p1944_p13 = scmp.lt.s32.totalorder %s1427_s29, %s1427_s29 }
  0x62   :  { %v1749_v25 = vld [vmem:[#allocation2 + $0x34] ss:$8 sps:$4 sm:$0xff]   ;;  %v1751_v26 = vld [vmem:[#allocation2 + $0x30] ss:$8 sps:$4 sm:$0xff]   ;;  %v1756_v27 = vld [vmem:[#allocation7 + $0x20] sm:$0xff]   ;;  %s1939_s3 = scalar_lea.vmem %s1427_s29, 64 }
  0x63   :  { %1601 = vmatpush3.bf16.msra.mxu1 %v1753_v10  ;;  %v1757_v28 = vld [vmem:[#allocation7 + $0x28] sm:$0xff]   ;;  %v1758_v29 = vld [vmem:[#allocation7 + $0x30] sm:$0xff]   ;;  %v1759_v30 = vld [vmem:[#allocation7 + $0x38] sm:$0xff]   ;;  %p1940_p12 = scmp.ne.s32.totalorder %s1427_s29, %s1939_s3  ;;  %p1945_p0 = scmp.lt.s32.totalorder %s1939_s3, %s1939_s3 }
  0x64   :  { %259 = vmatpush1.bf16.msra.mxu0 %v1729_v3  ;;  %1602 = vmatprep.subr.bf16.mxu1 %v1754_v13  ;;  %v1760_v31 = vld [vmem:[#allocation7 + $0x40] sm:$0xff]   ;;  %v1761_v55 = vld [vmem:[#allocation7 + $0x48] sm:$0xff]   ;;  %v1762_v62 = vld [vmem:[#allocation7 + $0x50] sm:$0xff]  }
  0x65   :  { %260 = vmatprep.subr.bf16.mxu0 %v1978_v0  ;;  %v2088_v35 = vld [vmem:[#allocation10] sm:$0xff]  ;;  %v1763_v2 = vld [vmem:[#allocation7 + $0x58] sm:$0xff]   ;;  %p1946_p1 = por %p1945_p0, %p1944_p13 }
  0x66   :  { %v125_v36 = vrot.slane %v2088_v35, %v124_v34  ;;  %v1764_v9 = vld [vmem:[#allocation7 + $0x60] sm:$0xff]  }
  0x67   :  { %1603 = vmatpush3.bf16.msra.mxu1 %v1754_v13  ;;  %v1765_v13 = vld [vmem:[#allocation7 + $0x68] sm:$0xff]   ;;  %p1947_p2 = pnand %p1946_p1, %p1940_p12 }
  0x68   :  { %261 = vmatpush1.bf16.msra.mxu0 %v1730_v4  ;;  %1604 = vmatprep.subr.bf16.mxu1 %v1755_v15 }
  0x69   :  { %262 = vmatprep.subr.bf16.mxu0 %v1978_v0 }
  0x6b   :  { %1605 = vmatpush3.bf16.msra.mxu1 %v1755_v15  ;;  %v1767_v15 = vld [vmem:[#allocation7 + $0x78] sm:$0xff]  }
  0x6c   :  { %263 = vmatpush1.bf16.msra.mxu0 %v1731_v6  ;;  %1606 = vmatprep.subr.bf16.mxu1 %v1756_v27 }
  0x6d   :  { %264 = vmatprep.subr.bf16.mxu0 %v1978_v0 }
  0x6f   :  { %1607 = vmatpush3.bf16.msra.mxu1 %v1756_v27 }
  0x70   :  { %265 = vmatpush1.bf16.msra.mxu0 %v1732_v7  ;;  %1608 = vmatprep.subr.bf16.mxu1 %v1757_v28 }
  0x71   :  { %266 = vmatprep.subr.bf16.mxu0 %v1978_v0 }
  0x73   :  { %1609 = vmatpush3.bf16.msra.mxu1 %v1757_v28 }
  0x74   :  { %267 = vmatpush1.bf16.msra.mxu0 %v1733_v11  ;;  %1610 = vmatprep.subr.bf16.mxu1 %v1758_v29 }
  0x75   :  { %268 = vmatprep.subr.bf16.mxu0 %v1978_v0 }
  0x77   :  { %1611 = vmatpush3.bf16.msra.mxu1 %v1758_v29 }
  0x78   :  { %269 = vmatpush1.bf16.msra.mxu0 %v1734_v14  ;;  %1612 = vmatprep.subr.bf16.mxu1 %v1759_v30  ;;  %v1766_v14 = vld [vmem:[#allocation7 + $0x70] sm:$0xff]  }
  0x79   :  { %270 = vmatprep.subr.bf16.mxu0 %v1978_v0 }
  0x7b   :  { %1613 = vmatpush3.bf16.msra.mxu1 %v1759_v30 }
  0x7c   :  { %271 = vmatpush1.bf16.msra.mxu0 %v1735_v16  ;;  %1622 = vmatprep.subr.bf16.mxu1 %v1760_v31  ;;  %v1768_v16 = vld [vmem:[#allocation7 + $0x80] sm:$0xff]  }
  0x7d   :  { %272 = vmatprep.subr.bf16.mxu0 %v1978_v0 }
  0x80   :  { %273 = vmatpush1.bf16.msra.mxu0 %v1736_v17  ;;  %v1769_v17 = vld [vmem:[#allocation7 + $0x88] sm:$0xff]  }
  0x81   :  { %274 = vmatprep.subr.bf16.mxu0 %v1978_v0 }
  0x84   :  { %275 = vmatpush1.bf16.msra.mxu0 %v1737_v18  ;;  %v1770_v18 = vld [vmem:[#allocation7 + $0x90] sm:$0xff]  }
  0x85   :  { %276 = vmatprep.subr.bf16.mxu0 %v1978_v0 }
  0x88   :  { %277 = vmatpush1.bf16.msra.mxu0 %v1738_v19  ;;  %v1771_v19 = vld [vmem:[#allocation7 + $0x98] sm:$0xff]  }
  0x89   :  { %278 = vmatprep.subr.bf16.mxu0 %v1978_v0 }
  0x8c   :  { %279 = vmatpush1.bf16.msra.mxu0 %v252_v12 }
  0x8d   :  { %1646 = vmatprep.subr.bf16.mxu0 %v1768_v16 }
  0x8f   :  { %287 = vmatmul.mubr.bf16.vlgmr.msra.gmra.mrb[0].mxu0 %v1740_v20  ;;  %v1772_v20 = vld [vmem:[#allocation7 + $0xa0] sm:$0xff]  }
  0x90   :  { %1459 = vmatprep.mubr.msk.bf16.mxu0 %vm237_vm0, %v1743_v21  ;;  %1647 = vmatpush3.bf16.msra.mxu0 %v1768_v16  ;;  %v1773_v21 = vld [vmem:[#allocation7 + $0xa8] sm:$0xff]  }
  0x91   :  { %1648 = vmatprep.subr.bf16.mxu0 %v1769_v17 }
  0x94   :  { %1649 = vmatpush3.bf16.msra.mxu0 %v1769_v17 }
  0x95   :  { %1650 = vmatprep.subr.bf16.mxu0 %v1770_v18 }
  0x97   :  { %295 = vmatmul.mubr.bf16.gmra.mrb[4].mxu0 %v1745_v22  ;;  %v349_v22 = vsub.s32 1, %v2085_v33 }
  0x98   :  { %1460 = vmatprep.mubr.msk.bf16.mxu0 %vm237_vm0, %v1746_v23  ;;  %1651 = vmatpush3.bf16.msra.mxu0 %v1770_v18 }
  0x99   :  { %1652 = vmatprep.subr.bf16.mxu0 %v1771_v19  ;;  %v350_v23 = vrot.slane %v2088_v35, %v349_v22 }
  0x9c   :  { %1653 = vmatpush3.bf16.msra.mxu0 %v1771_v19 }
  0x9d   :  { %1654 = vmatprep.subr.bf16.mxu0 %v1772_v20 }
  0x9f   :  { %303 = vmatmul.mubr.bf16.gmra.mrb[8].mxu0 %v1748_v24 }
  0xa0   :  { %1461 = vmatprep.mubr.msk.bf16.mxu0 %vm237_vm0, %v1749_v25  ;;  %1655 = vmatpush3.bf16.msra.mxu0 %v1772_v20 }
  0xa1   :  { %1656 = vmatprep.subr.bf16.mxu0 %v1773_v21 }
  0xa4   :  { %1657 = vmatpush3.bf16.msra.mxu0 %v1773_v21 }
  0xa7   :  { %311 = vmatmul.mubr.bf16.gmra.mrb[12].mxu0 %v1751_v26 }
 0x162   :  { %v288_v37 = vpop.f32.mrb[0].mxu0 }
 0x163   :  { %v289_v38 = vadd.f32 %v288_v37, %v125_v36  ;;  %v290_v39 = vpop.f32.mrb[1].mxu0 }
 0x164   :  { %v291_v40 = vpop.f32.mrb[2].mxu0 }
 0x165   :  { %v292_v41 = vadd.f32 %v291_v40, %v125_v36  ;;  %v293_v42 = vpop.f32.mrb[3].mxu0  ;;  %v319_v43 = vmax.f32 %v289_v38, 0.0 }
 0x167   :  { %v320_v44 = vmax.f32 %v292_v41, 0.0 }
 0x169   :  { %v327_v45 = vpack.c.bf16 %v320_v44, %v319_v43 }
 0x16a   :  { %v296_v46 = vpop.f32.mrb[4].mxu0 }
 0x16b   :  { %v297_v47 = vadd.f32 %v296_v46, %v125_v36  ;;  %v298_v48 = vpop.f32.mrb[5].mxu0  ;;  %1614 = vmatprep.mubr.bf16.mxu1 %v327_v45 }
 0x16c   :  { %v299_v49 = vpop.f32.mrb[6].mxu0 }
 0x16d   :  { %v300_v50 = vadd.f32 %v299_v49, %v125_v36  ;;  %v301_v51 = vpop.f32.mrb[7].mxu0  ;;  %v321_v52 = vmax.f32 %v297_v47, 0.0 }
 0x16f   :  { %v322_v53 = vmax.f32 %v300_v50, 0.0 }
 0x171   :  { %v328_v54 = vpack.c.bf16 %v322_v53, %v321_v52 }
 0x172   :  { %v304_v56 = vpop.f32.mrb[8].mxu0 }
 0x173   :  { %v305_v57 = vadd.f32 %v304_v56, %v125_v36  ;;  %v306_v58 = vpop.f32.mrb[9].mxu0  ;;  %1615 = vmatmul.mubr.bf16.vlgmr.msra.gmra.mrb[0].mxu1 %v328_v54  ;;  %v1774_v54 = vld [vmem:[#allocation7 + $0xb0] sm:$0xff]   ;;  %v1776_v56 = vld [vmem:[#allocation7 + $0xc0] sm:$0xff]  }
 0x174   :  { %v307_v59 = vpop.f32.mrb[10].mxu0  ;;  %1623 = vmatpush3.bf16.msra.mxu1 %v1760_v31  ;;  %1658 = vmatprep.subr.bf16.mxu0 %v1774_v54  ;;  %v1778_v58 = vld [vmem:[#allocation7 + $0xd0] sm:$0xff]  }
 0x175   :  { %v308_v60 = vadd.f32 %v307_v59, %v125_v36  ;;  %v309_v61 = vpop.f32.mrb[11].mxu0  ;;  %1624 = vmatprep.subr.bf16.mxu1 %v1761_v55  ;;  %v323_v63 = vmax.f32 %v305_v57, 0.0  ;;  %1659 = vmatpush3.bf16.msra.mxu0 %v1774_v54  ;;  %v1777_v57 = vld [vmem:[#allocation7 + $0xc8] sm:$0xff]   ;;  %v1779_v59 = vld [vmem:[#allocation7 + $0xd8] sm:$0xff]  }
 0x176   :  { %v1781_v61 = vld [vmem:[#allocation7 + $0xe8] sm:$0xff]  }
 0x177   :  { %v324_v0 = vmax.f32 %v308_v60, 0.0  ;;  %v1780_v60 = vld [vmem:[#allocation7 + $0xe0] sm:$0xff]  }
 0x178   :  { %1625 = vmatpush3.bf16.msra.mxu1 %v1761_v55  ;;  %v1775_v55 = vld [vmem:[#allocation7 + $0xb8] sm:$0xff]  }
 0x179   :  { %v329_v1 = vpack.c.bf16 %v324_v0, %v323_v63  ;;  %1626 = vmatprep.subr.bf16.mxu1 %v1762_v62  ;;  %1660 = vmatprep.subr.bf16.mxu0 %v1775_v55 }
 0x17a   :  { %v312_v3 = vpop.f32.mrb[12].mxu0  ;;  %1661 = vmatpush3.bf16.msra.mxu0 %v1775_v55 }
 0x17b   :  { %v313_v4 = vadd.f32 %v312_v3, %v125_v36  ;;  %v314_v5 = vpop.f32.mrb[13].mxu0  ;;  %1618 = vmatprep.mubr.bf16.mxu1 %v329_v1 }
 0x17c   :  { %v315_v6 = vpop.f32.mrb[14].mxu0  ;;  %1627 = vmatpush3.bf16.msra.mxu1 %v1762_v62  ;;  %v495_v62 = vsub.s32 2, %v2085_v33 }
 0x17d   :  { %v316_v7 = vadd.f32 %v315_v6, %v125_v36  ;;  %v317_v8 = vpop.f32.mrb[15].mxu0  ;;  %1628 = vmatprep.subr.bf16.mxu1 %v1763_v2  ;;  %v325_v10 = vmax.f32 %v313_v4, 0.0 }
 0x17e   :  { %v496_v63 = vrot.slane %v2088_v35, %v495_v62  ;;  %v1784_v62 = vld [vmem:[#allocation8 + $0x40] sm:$0xff]  }
 0x17f   :  { %v326_v11 = vmax.f32 %v316_v7, 0.0  ;;  %1567 = vmatprep.subr.bf16.mxu0 %v1784_v62 }
 0x180   :  { %1629 = vmatpush3.bf16.msra.mxu1 %v1763_v2 }
 0x181   :  { %v330_v12 = vpack.c.bf16 %v326_v11, %v325_v10  ;;  %1630 = vmatprep.subr.bf16.mxu1 %v1764_v9 }
 0x183   :  { %1619 = vmatmul.mubr.bf16.gmra.mrb[4].mxu1 %v330_v12 }
 0x184   :  { %1631 = vmatpush3.bf16.msra.mxu1 %v1764_v9 }
 0x185   :  { %1632 = vmatprep.subr.bf16.mxu1 %v1765_v13 }
 0x188   :  { %1633 = vmatpush3.bf16.msra.mxu1 %v1765_v13 }
 0x189   :  { %1634 = vmatprep.subr.bf16.mxu1 %v1766_v14 }
 0x18c   :  { %1635 = vmatpush3.bf16.msra.mxu1 %v1766_v14 }
 0x18d   :  { %1636 = vmatprep.subr.bf16.mxu1 %v1767_v15 }
 0x190   :  { %1637 = vmatpush3.bf16.msra.mxu1 %v1767_v15 }
 0x191   :  { %1670 = vmatprep.subr.bf16.mxu1 %v1776_v56 }
 0x246   :  { %v1616_v24 = vpop.f32.mrb[0].mxu1 }
 0x247   :  { %v442_v25 = vadd.f32 %v1616_v24, %v350_v23  ;;  %v433_v26 = vpop.f32.mrb[1].mxu1 }
 0x248   :  { %v434_v27 = vadd.f32 %v433_v26, %v350_v23  ;;  %v1617_v28 = vpop.f32.mrb[2].mxu1 }
 0x249   :  { %v445_v29 = vadd.f32 %v1617_v28, %v350_v23  ;;  %v436_v30 = vpop.f32.mrb[3].mxu1  ;;  %v466_v32 = vmax.f32 %v442_v25, 0.0  ;;  %v1782_v28 = vld [vmem:[#allocation7 + $0xf0] sm:$0xff]  }
 0x24a   :  { %v437_v31 = vadd.f32 %v436_v30, %v350_v23  ;;  %v464_v36 = vmax.f32 %v434_v27, 0.0  ;;  %v641_v30 = vsub.s32 3, %v2085_v33 }
 0x24b   :  { %v467_v34 = vmax.f32 %v445_v29, 0.0  ;;  %v1783_v29 = vld [vmem:[#allocation7 + $0xf8] sm:$0xff]  }
 0x24c   :  { %v465_v37 = vmax.f32 %v437_v31, 0.0  ;;  %v642_v31 = vrot.slane %v2088_v35, %v641_v30 }
 0x24d   :  { %v473_v38 = vpack.c.bf16 %v467_v34, %v466_v32 }
 0x24e   :  { %v472_v39 = vpack.c.bf16 %v465_v37, %v464_v36 }
 0x250   :  { %1638 = vmatprep.mubr.bf16.mxu1 %v472_v39 }
 0x251   :  { %1639 = vmatmul.mubr.bf16.vlgmr.msra.gmra.mrb[8].mxu1 %v473_v38 }
 0x252   :  { %1671 = vmatpush3.bf16.msra.mxu1 %v1776_v56 }
 0x253   :  { %1672 = vmatprep.subr.bf16.mxu1 %v1777_v57 }
 0x256   :  { %v1620_v40 = vpop.f32.mrb[4].mxu1  ;;  %1673 = vmatpush3.bf16.msra.mxu1 %v1777_v57 }
 0x257   :  { %v458_v41 = vadd.f32 %v1620_v40, %v350_v23  ;;  %v449_v42 = vpop.f32.mrb[5].mxu1  ;;  %1674 = vmatprep.subr.bf16.mxu1 %v1778_v58 }
 0x258   :  { %v450_v43 = vadd.f32 %v449_v42, %v350_v23  ;;  %v1621_v44 = vpop.f32.mrb[6].mxu1 }
 0x259   :  { %v461_v45 = vadd.f32 %v1621_v44, %v350_v23  ;;  %v452_v46 = vpop.f32.mrb[7].mxu1  ;;  %v470_v48 = vmax.f32 %v458_v41, 0.0 }
 0x25a   :  { %v453_v47 = vadd.f32 %v452_v46, %v350_v23  ;;  %v468_v50 = vmax.f32 %v450_v43, 0.0  ;;  %1675 = vmatpush3.bf16.msra.mxu1 %v1778_v58 }
 0x25b   :  { %v471_v49 = vmax.f32 %v461_v45, 0.0  ;;  %1676 = vmatprep.subr.bf16.mxu1 %v1779_v59 }
 0x25c   :  { %v469_v51 = vmax.f32 %v453_v47, 0.0 }
 0x25d   :  { %v475_v52 = vpack.c.bf16 %v471_v49, %v470_v48 }
 0x25e   :  { %v474_v53 = vpack.c.bf16 %v469_v51, %v468_v50  ;;  %1677 = vmatpush3.bf16.msra.mxu1 %v1779_v59 }
 0x25f   :  { %1678 = vmatprep.subr.bf16.mxu1 %v1780_v60 }
 0x260   :  { %1642 = vmatprep.mubr.bf16.mxu1 %v474_v53 }
 0x261   :  { %1643 = vmatmul.mubr.bf16.gmra.mrb[12].mxu1 %v475_v52 }
 0x262   :  { %1679 = vmatpush3.bf16.msra.mxu1 %v1780_v60 }
 0x263   :  { %1680 = vmatprep.subr.bf16.mxu1 %v1781_v61 }
 0x266   :  { %1681 = vmatpush3.bf16.msra.mxu1 %v1781_v61 }
 0x267   :  { %1682 = vmatprep.subr.bf16.mxu1 %v1782_v28 }
 0x26a   :  { %1683 = vmatpush3.bf16.msra.mxu1 %v1782_v28 }
 0x26b   :  { %1684 = vmatprep.subr.bf16.mxu1 %v1783_v29 }
 0x26e   :  { %1685 = vmatpush3.bf16.msra.mxu1 %v1783_v29 }
 0x324   :  { %v1640_v0 = vpop.f32.mrb[8].mxu1 }
 0x325   :  { %v588_v1 = vadd.f32 %v1640_v0, %v496_v63  ;;  %v579_v2 = vpop.f32.mrb[9].mxu1  ;;  %v1786_v0 = vld [vmem:[#allocation8 + $0x48] sm:$0xff]  }
 0x326   :  { %v580_v3 = vadd.f32 %v579_v2, %v496_v63  ;;  %v1641_v4 = vpop.f32.mrb[10].mxu1  ;;  %v1788_v2 = vld [vmem:[#allocation8 + $0x50] sm:$0xff]  }
 0x327   :  { %v591_v5 = vadd.f32 %v1641_v4, %v496_v63  ;;  %v582_v6 = vpop.f32.mrb[11].mxu1  ;;  %v612_v8 = vmax.f32 %v588_v1, 0.0  ;;  %v1787_v1 = vld [vmem:[#allocation8 + $0x8] sm:$0xff]   ;;  %v1790_v4 = vld [vmem:[#allocation8 + $0x58] sm:$0xff]  }
 0x328   :  { %v583_v7 = vadd.f32 %v582_v6, %v496_v63  ;;  %v610_v10 = vmax.f32 %v580_v3, 0.0  ;;  %v1789_v3 = vld [vmem:[#allocation8 + $0x10] sm:$0xff]   ;;  %v1792_v6 = vld [vmem:[#allocation8 + $0x60] sm:$0xff]  }
 0x329   :  { %v613_v9 = vmax.f32 %v591_v5, 0.0  ;;  %v1791_v5 = vld [vmem:[#allocation8 + $0x18] sm:$0xff]  }
 0x32a   :  { %v611_v11 = vmax.f32 %v583_v7, 0.0  ;;  %v1793_v7 = vld [vmem:[#allocation8 + $0x20] sm:$0xff]  }
 0x32b   :  { %v619_v12 = vpack.c.bf16 %v613_v9, %v612_v8  ;;  %v1794_v8 = vld [vmem:[#allocation8 + $0x68] sm:$0xff]  }
 0x32c   :  { %v618_v13 = vpack.c.bf16 %v611_v11, %v610_v10  ;;  %v1795_v9 = vld [vmem:[#allocation8 + $0x28] sm:$0xff]   ;;  %v1796_v10 = vld [vmem:[#allocation8 + $0x70] sm:$0xff]  }
 0x32d   :  { %v1797_v11 = vld [vmem:[#allocation8 + $0x30] sm:$0xff]  }
 0x32e   :  { %1662 = vmatprep.mubr.bf16.mxu0 %v618_v13  ;;  %v1799_v13 = vld [vmem:[#allocation8 + $0x38] sm:$0xff]  }
 0x32f   :  { %1663 = vmatmul.mubr.bf16.vlgmr.msra.gmra.mrb[16].mxu0 %v619_v12  ;;  %v1798_v12 = vld [vmem:[#allocation8 + $0x78] sm:$0xff]  }
 0x334   :  { %v1644_v14 = vpop.f32.mrb[12].mxu1 }
 0x335   :  { %v604_v15 = vadd.f32 %v1644_v14, %v496_v63  ;;  %v595_v16 = vpop.f32.mrb[13].mxu1  ;;  %v1800_v14 = vld [vmem:[#allocation7 + $0x100] sm:$0xff]  }
 0x336   :  { %v596_v17 = vadd.f32 %v595_v16, %v496_v63  ;;  %v1645_v18 = vpop.f32.mrb[14].mxu1  ;;  %v1801_v16 = vld [vmem:[#allocation7 + $0x108] sm:$0xff]  }
 0x337   :  { %v607_v19 = vadd.f32 %v1645_v18, %v496_v63  ;;  %v598_v20 = vpop.f32.mrb[15].mxu1  ;;  %v616_v22 = vmax.f32 %v604_v15, 0.0  ;;  %v1979_v15 = vmov 0.0   ;;  %v1803_v18 = vld [vmem:[#allocation7 + $0x118] sm:$0xff]  }
 0x338   :  { %v599_v21 = vadd.f32 %v598_v20, %v496_v63  ;;  %v614_v24 = vmax.f32 %v596_v17, 0.0  ;;  %v1785_v63 = vld [vmem:[#allocation8] sm:$0xff]   ;;  %1694 = vmatprep.subr.bf16.mxu1 %v1979_v15  ;;  %v1802_v17 = vld [vmem:[#allocation7 + $0x110] sm:$0xff]   ;;  %v1805_v20 = vld [vmem:[#allocation7 + $0x128] sm:$0xff]  }
 0x339   :  { %v617_v23 = vmax.f32 %v607_v19, 0.0  ;;  %1568 = vmatpush3.bf16.msra.mxu0 %v1785_v63  ;;  %v1804_v19 = vld [vmem:[#allocation7 + $0x120] sm:$0xff]  }
 0x33a   :  { %v615_v25 = vmax.f32 %v599_v21, 0.0  ;;  %1569 = vmatprep.subr.bf16.mxu0 %v1786_v0  ;;  %v787_v21 = vsub.s32 4, %v2085_v33 }
 0x33b   :  { %v621_v26 = vpack.c.bf16 %v617_v23, %v616_v22 }
 0x33c   :  { %v620_v27 = vpack.c.bf16 %v615_v25, %v614_v24  ;;  %v2106_v22 = vrot.slane %v2088_v35, %v787_v21 }
 0x33d   :  { %1570 = vmatpush3.bf16.msra.mxu0 %v1787_v1 }
 0x33e   :  { %1666 = vmatprep.mubr.bf16.mxu0 %v620_v27  ;;  %1571 = vmatprep.subr.bf16.mxu0 %v1788_v2 }
 0x33f   :  { %1667 = vmatmul.mubr.bf16.gmra.mrb[20].mxu0 %v621_v26 }
 0x341   :  { %1572 = vmatpush3.bf16.msra.mxu0 %v1789_v3 }
 0x342   :  { %1573 = vmatprep.subr.bf16.mxu0 %v1790_v4 }
 0x345   :  { %1574 = vmatpush3.bf16.msra.mxu0 %v1791_v5 }
 0x346   :  { %1575 = vmatprep.subr.bf16.mxu0 %v1792_v6 }
 0x349   :  { %1576 = vmatpush3.bf16.msra.mxu0 %v1793_v7 }
 0x34a   :  { %1577 = vmatprep.subr.bf16.mxu0 %v1794_v8 }
 0x34d   :  { %1578 = vmatpush3.bf16.msra.mxu0 %v1795_v9 }
 0x34e   :  { %1579 = vmatprep.subr.bf16.mxu0 %v1796_v10 }
 0x351   :  { %1580 = vmatpush3.bf16.msra.mxu0 %v1797_v11 }
 0x352   :  { %1581 = vmatprep.subr.bf16.mxu0 %v1798_v12 }
 0x355   :  { %1582 = vmatpush3.bf16.msra.mxu0 %v1799_v13 }
 0x402   :  { %v1664_v32 = vpop.f32.mrb[16].mxu0 }
 0x403   :  { %v734_v34 = vadd.f32 %v1664_v32, %v642_v31  ;;  %v725_v36 = vpop.f32.mrb[17].mxu0 }
 0x404   :  { %v726_v37 = vadd.f32 %v725_v36, %v642_v31  ;;  %v1665_v38 = vpop.f32.mrb[18].mxu0 }
 0x405   :  { %v737_v39 = vadd.f32 %v1665_v38, %v642_v31  ;;  %v728_v40 = vpop.f32.mrb[19].mxu0  ;;  %v758_v42 = vmax.f32 %v734_v34, 0.0 }
 0x406   :  { %v729_v41 = vadd.f32 %v728_v40, %v642_v31  ;;  %v756_v44 = vmax.f32 %v726_v37, 0.0 }
 0x407   :  { %v759_v43 = vmax.f32 %v737_v39, 0.0 }
 0x408   :  { %v757_v45 = vmax.f32 %v729_v41, 0.0 }
 0x409   :  { %v765_v46 = vpack.c.bf16 %v759_v43, %v758_v42 }
 0x40a   :  { %v764_v47 = vpack.c.bf16 %v757_v45, %v756_v44 }
 0x40c   :  { %1686 = vmatprep.mubr.bf16.mxu1 %v764_v47 }
 0x40d   :  { %1687 = vmatmul.mubr.bf16.vlgmr.msra.gmra.mrb[16].mxu1 %v765_v46 }
 0x40e   :  { %1695 = vmatpush3.bf16.msra.mxu1 %v1800_v14 }
 0x40f   :  { %1696 = vmatprep.subr.bf16.mxu1 %v1979_v15 }
 0x412   :  { %v1668_v48 = vpop.f32.mrb[20].mxu0  ;;  %1697 = vmatpush3.bf16.msra.mxu1 %v1801_v16 }
 0x413   :  { %v750_v49 = vadd.f32 %v1668_v48, %v642_v31  ;;  %v741_v50 = vpop.f32.mrb[21].mxu0  ;;  %1698 = vmatprep.subr.bf16.mxu1 %v1979_v15 }
 0x414   :  { %v742_v51 = vadd.f32 %v741_v50, %v642_v31  ;;  %v1669_v52 = vpop.f32.mrb[22].mxu0 }
 0x415   :  { %v753_v53 = vadd.f32 %v1669_v52, %v642_v31  ;;  %v744_v54 = vpop.f32.mrb[23].mxu0  ;;  %v762_v56 = vmax.f32 %v750_v49, 0.0 }
 0x416   :  { %v745_v55 = vadd.f32 %v744_v54, %v642_v31  ;;  %v760_v58 = vmax.f32 %v742_v51, 0.0  ;;  %1699 = vmatpush3.bf16.msra.mxu1 %v1802_v17 }
 0x417   :  { %v763_v57 = vmax.f32 %v753_v53, 0.0  ;;  %1700 = vmatprep.subr.bf16.mxu1 %v1979_v15 }
 0x418   :  { %v761_v59 = vmax.f32 %v745_v55, 0.0 }
 0x419   :  { %v767_v60 = vpack.c.bf16 %v763_v57, %v762_v56 }
 0x41a   :  { %v766_v61 = vpack.c.bf16 %v761_v59, %v760_v58  ;;  %1701 = vmatpush3.bf16.msra.mxu1 %v1803_v18 }
 0x41b   :  { %1702 = vmatprep.subr.bf16.mxu1 %v1979_v15 }
 0x41c   :  { %1690 = vmatprep.mubr.bf16.mxu1 %v766_v61 }
 0x41d   :  { %1691 = vmatmul.mubr.bf16.gmra.mrb[20].mxu1 %v767_v60 }
 0x41e   :  { %1703 = vmatpush3.bf16.msra.mxu1 %v1804_v19 }
 0x41f   :  { %1704 = vmatprep.subr.bf16.mxu1 %v1979_v15 }
 0x422   :  { %1705 = vmatpush3.bf16.msra.mxu1 %v1805_v20 }
 0x423   :  { %1706 = vmatprep.subr.bf16.mxu1 %v1979_v15 }
 0x4e0   :  { %v1688_v23 = vpop.f32.mrb[16].mxu1 }
 0x4e1   :  { %v880_v24 = vadd.f32 %v1688_v23, %v2106_v22  ;;  %v871_v25 = vpop.f32.mrb[17].mxu1 }
 0x4e2   :  { %v872_v26 = vadd.f32 %v871_v25, %v2106_v22  ;;  %v1689_v27 = vpop.f32.mrb[18].mxu1 }
 0x4e3   :  { %v914_v28 = vrot.slane %v880_v24, 4  ;;  %v883_v29 = vadd.f32 %v1689_v27, %v2106_v22  ;;  %v874_v30 = vpop.f32.mrb[19].mxu1 }
 0x4e4   :  { %v902_v31 = vrot.slane %v872_v26, 4  ;;  %v875_v32 = vadd.f32 %v874_v30, %v2106_v22 }
 0x4e5   :  { %v915_v34 = vadd.f32 %v914_v28, %v880_v24  ;;  %v920_v36 = vrot.slane %v883_v29, 4 }
 0x4e6   :  { %v903_v37 = vadd.f32 %v902_v31, %v872_v26  ;;  %v908_v38 = vrot.slane %v875_v32, 4 }
 0x4e7   :  { %v916_v39 = vrot.slane %v915_v34, 2  ;;  %v921_v40 = vadd.f32 %v920_v36, %v883_v29 }
 0x4e8   :  { %v904_v41 = vrot.slane %v903_v37, 2  ;;  %v909_v42 = vadd.f32 %v908_v38, %v875_v32 }
 0x4e9   :  { %v917_v43 = vadd.f32 %v916_v39, %v915_v34  ;;  %v922_v44 = vrot.slane %v921_v40, 2 }
 0x4ea   :  { %v905_v45 = vadd.f32 %v904_v41, %v903_v37  ;;  %v910_v46 = vrot.slane %v909_v42, 2 }
 0x4eb   :  { %v918_v47 = vrot.slane %v917_v43, 1  ;;  %v923_v48 = vadd.f32 %v922_v44, %v921_v40 }
 0x4ec   :  { %v906_v49 = vrot.slane %v905_v45, 1  ;;  %v911_v50 = vadd.f32 %v910_v46, %v909_v42 }
 0x4ed   :  { %v919_v51 = vadd.f32 %v918_v47, %v917_v43  ;;  %v924_v52 = vrot.slane %v923_v48, 1 }
 0x4ee   :  { %v907_v53 = vadd.f32 %v906_v49, %v905_v45  ;;  %v912_v54 = vrot.slane %v911_v50, 1 }
 0x4ef   :  { %v953_v55 = vmul.f32 0.125, %v919_v51  ;;  %v925_v56 = vadd.f32 %v924_v52, %v923_v48 }
 0x4f0   :  { %v951_v57 = vmul.f32 0.125, %v907_v53  ;;  %v913_v58 = vadd.f32 %v912_v54, %v911_v50  ;;  %v1692_v59 = vpop.f32.mrb[20].mxu1 }
 0x4f1   :  { %v961_v60 = vsub.f32 %v880_v24, %v953_v55  ;;  %v954_v61 = vmul.f32 0.125, %v925_v56  ;;  %v2113_v62 = vadd.f32 %v1692_v59, %v2106_v22  ;;  %v887_v63 = vpop.f32.mrb[21].mxu1 }
 0x4f2   :  { %v959_v0 = vsub.f32 %v872_v26, %v951_v57  ;;  %v952_v1 = vmul.f32 0.125, %v913_v58  ;;  %v2116_v2 = vadd.f32 %v887_v63, %v2106_v22  ;;  %v1693_v3 = vpop.f32.mrb[22].mxu1 }
 0x4f3   :  { %v969_v4 = vmul.f32 %v961_v60, %v961_v60  ;;  %v962_v5 = vsub.f32 %v883_v29, %v954_v61  ;;  %v938_v6 = vrot.slane %v2113_v62, 4  ;;  %v2120_v7 = vadd.f32 %v1693_v3, %v2106_v22  ;;  %v890_v8 = vpop.f32.mrb[23].mxu1 }
 0x4f4   :  { %v967_v9 = vmul.f32 %v959_v0, %v959_v0  ;;  %v960_v10 = vsub.f32 %v875_v32, %v952_v1  ;;  %v1097_v11 = vsel %vm1096_vm2, %v952_v1, %v951_v57  ;;  %v926_v12 = vrot.slane %v2116_v2, 4 }
 0x4f5   :  { %v987_v13 = vrot.slane %v969_v4, 4  ;;  %v970_v14 = vmul.f32 %v962_v5, %v962_v5  ;;  %v1099_v16 = vsel %vm1098_vm3, %v953_v55, %v1097_v11  ;;  %v939_v17 = vadd.f32 %v938_v6, %v2113_v62 }
 0x4f6   :  { %v975_v18 = vrot.slane %v967_v9, 4  ;;  %v968_v19 = vmul.f32 %v960_v10, %v960_v10  ;;  %v927_v20 = vadd.f32 %v926_v12, %v2116_v2  ;;  %v1101_v21 = vsel %vm1100_vm4, %v954_v61, %v1099_v16 }
 0x4f7   :  { %v988_v23 = vadd.f32 %v987_v13, %v969_v4  ;;  %v993_v24 = vrot.slane %v970_v14, 4  ;;  %v940_v25 = vrot.slane %v939_v17, 2  ;;  %v944_v26 = vrot.slane %v2120_v7, 4 }
 0x4f8   :  { %v976_v27 = vadd.f32 %v975_v18, %v967_v9  ;;  %v981_v28 = vrot.slane %v968_v19, 4  ;;  %v928_v29 = vrot.slane %v927_v20, 2  ;;  %v2130_v30 = vadd.f32 %v890_v8, %v2106_v22 }
 0x4f9   :  { %v989_v31 = vrot.slane %v988_v23, 2  ;;  %v994_v32 = vadd.f32 %v993_v24, %v970_v14  ;;  %v941_v34 = vadd.f32 %v940_v25, %v939_v17  ;;  %v945_v36 = vadd.f32 %v944_v26, %v2120_v7 }
 0x4fa   :  { %v977_v37 = vrot.slane %v976_v27, 2  ;;  %v982_v38 = vadd.f32 %v981_v28, %v968_v19  ;;  %v929_v39 = vadd.f32 %v928_v29, %v927_v20  ;;  %v932_v40 = vrot.slane %v2130_v30, 4 }
 0x4fb   :  { %v990_v41 = vadd.f32 %v989_v31, %v988_v23  ;;  %v995_v42 = vrot.slane %v994_v32, 2  ;;  %v942_v43 = vrot.slane %v941_v34, 1  ;;  %v946_v44 = vrot.slane %v945_v36, 2 }
 0x4fc   :  { %v978_v45 = vadd.f32 %v977_v37, %v976_v27  ;;  %v983_v46 = vrot.slane %v982_v38, 2  ;;  %v930_v47 = vrot.slane %v929_v39, 1  ;;  %v933_v22 = vadd.f32 %v932_v40, %v2130_v30 }
 0x4fd   :  { %v991_v48 = vrot.slane %v990_v41, 1  ;;  %v996_v49 = vadd.f32 %v995_v42, %v994_v32  ;;  %v943_v50 = vadd.f32 %v942_v43, %v941_v34  ;;  %v947_v51 = vadd.f32 %v946_v44, %v945_v36 }
 0x4fe   :  { %v979_v52 = vrot.slane %v978_v45, 1  ;;  %v984_v53 = vadd.f32 %v983_v46, %v982_v38  ;;  %v931_v54 = vadd.f32 %v930_v47, %v929_v39  ;;  %v934_v55 = vrot.slane %v933_v22, 2 }
 0x4ff   :  { %v992_v56 = vadd.f32 %v991_v48, %v990_v41  ;;  %v997_v57 = vrot.slane %v996_v49, 1  ;;  %v957_v58 = vmul.f32 0.125, %v943_v50  ;;  %v948_v59 = vrot.slane %v947_v51, 1 }
 0x500   :  { %v980_v60 = vadd.f32 %v979_v52, %v978_v45  ;;  %v985_v61 = vrot.slane %v984_v53, 1  ;;  %v955_v63 = vmul.f32 0.125, %v931_v54  ;;  %v935_v0 = vadd.f32 %v934_v55, %v933_v22 }
 0x501   :  { %v2135_v1 = vmul.f32 0.14285715, %v992_v56  ;;  %v998_v3 = vadd.f32 %v997_v57, %v996_v49  ;;  %v965_v4 = vsub.f32 %v2113_v62, %v957_v58  ;;  %v949_v5 = vadd.f32 %v948_v59, %v947_v51 }
 0x502   :  { %v1024_v6 = vmul.f32 0.14285715, %v980_v60  ;;  %v986_v8 = vadd.f32 %v985_v61, %v984_v53  ;;  %v963_v9 = vsub.f32 %v2116_v2, %v955_v63  ;;  %v1103_v10 = vsel %vm1102_vm5, %v955_v63, %v1101_v21 }
 0x503   :  { %1808 = vrsqrt.f32 %v2135_v1  ;;  %v2141_v11 = vmul.f32 0.14285715, %v998_v3  ;;  %v973_v12 = vmul.f32 %v965_v4, %v965_v4  ;;  %v2143_v13 = vmul.f32 0.125, %v949_v5 }
 0x504   :  { %1810 = vrsqrt.f32 %v1024_v6  ;;  %v1025_v14 = vmul.f32 0.14285715, %v986_v8  ;;  %v971_v62 = vmul.f32 %v963_v9, %v963_v9  ;;  %v936_v19 = vrot.slane %v935_v0, 1 }
 0x505   :  { %1812 = vrsqrt.f32 %v2141_v11  ;;  %v1011_v16 = vrot.slane %v973_v12, 4  ;;  %v966_v2 = vsub.f32 %v2120_v7, %v2143_v13  ;;  %vm1034_vm8 = vcmp.eq.f32.partialorder %v1024_v6, inf }
 0x506   :  { %1814 = vrsqrt.f32 %v1025_v14  ;;  %v999_v18 = vrot.slane %v971_v62, 4  ;;  %v937_v24 = vadd.f32 %v936_v19, %v935_v0  ;;  %vm1036_vm9 = vcmp.eq.f32.partialorder %v1024_v6, 0.0 }
 0x507   :  { %v1012_v17 = vadd.f32 %v1011_v16, %v973_v12  ;;  %v974_v23 = vmul.f32 %v966_v2, %v966_v2  ;;  %v1037_v29 = vand.u32 2147483648, %v1024_v6  ;;  %vm1041_vm11 = vcmp.eq.f32.partialorder %v1025_v14, inf }
 0x508   :  { %v1000_v21 = vadd.f32 %v999_v18, %v971_v62  ;;  %v956_v28 = vmul.f32 0.125, %v937_v24  ;;  %vm1043_vm12 = vcmp.eq.f32.partialorder %v1025_v14, 0.0  ;;  %v1044_v37 = vand.u32 2147483648, %v1025_v14 }
 0x509   :  { %v1013_v20 = vrot.slane %v1012_v17, 2  ;;  %v1017_v27 = vrot.slane %v974_v23, 4  ;;  %vm1048_vm13 = vcmp.eq.f32.partialorder %v2135_v1, inf  ;;  %v1051_v50 = vand.u32 2147483648, %v2135_v1 }
 0x50a   :  { %v1001_v26 = vrot.slane %v1000_v21, 2  ;;  %v964_v7 = vsub.f32 %v2130_v30, %v956_v28  ;;  %v1105_v39 = vsel %vm1104_vm6, %v956_v28, %v1103_v10  ;;  %vm1055_vm14 = vcmp.eq.f32.partialorder %v2141_v11, inf }
 0x50b   :  { %v1014_v25 = vadd.f32 %v1013_v20, %v1012_v17  ;;  %v1018_v34 = vadd.f32 %v1017_v27, %v974_v23  ;;  %v1107_v30 = vsel %vm1106_vm7, %v957_v58, %v1105_v39  ;;  %vm1050_vm15 = vcmp.eq.f32.partialorder %v2135_v1, 0.0 }
 0x50c   :  { %v1002_v32 = vadd.f32 %v1001_v26, %v1000_v21  ;;  %v972_v46 = vmul.f32 %v964_v7, %v964_v7  ;;  %v1058_v0 = vand.u32 2147483648, %v2141_v11  ;;  %vm1057_vm0 = vcmp.eq.f32.partialorder %v2141_v11, 0.0 }
 0x50d   :  { %v1809_v31 = vpop.eup %1808  ;;  %v1015_v38 = vrot.slane %v1014_v25, 1  ;;  %v1019_v43 = vrot.slane %v1018_v34, 2  ;;  %v1109_v9 = vsel %vm1108_vm10, %v2143_v13, %v1107_v30 }
 0x50e   :  { %v1811_v36 = vpop.eup %1810  ;;  %v1003_v42 = vrot.slane %v1002_v32, 1  ;;  %v1047_v44 = vmul.f32 %v1809_v31, %v2135_v1  ;;  %v1005_v53 = vrot.slane %v972_v46, 4 }
 0x50f   :  { %v1813_v40 = vpop.eup %1812  ;;  %v1033_v41 = vmul.f32 %v1811_v36, %v1024_v6  ;;  %v1016_v51 = vadd.f32 %v1015_v38, %v1014_v25  ;;  %v1020_v52 = vadd.f32 %v1019_v43, %v1018_v34  ;;  %v1127_v43 = vpack.c.bf16 %v1109_v9, %v1109_v9 }
 0x510   :  { %v1815_v45 = vpop.eup %1814  ;;  %v1054_v47 = vmul.f32 %v1813_v40, %v2141_v11  ;;  %v1004_v49 = vadd.f32 %v1003_v42, %v1002_v32  ;;  %v1049_v57 = vsel %vm1048_vm13, %v2135_v1, %v1047_v44  ;;  %v1006_v60 = vadd.f32 %v1005_v53, %v972_v46  ;;  %v1806_v44 = vld [vmem:[#allocation7 + $0x130] sm:$0xff]  }
 0x511   :  { %v1035_v22 = vsel %vm1034_vm8, %v1024_v6, %v1033_v41  ;;  %v1040_v48 = vmul.f32 %v1815_v45, %v1025_v14  ;;  %v1021_v59 = vrot.slane %v1020_v52, 1  ;;  %v1052_v5 = vsel %vm1050_vm15, %v1051_v50, %v1049_v57  ;;  %1707 = vmatpush3.bf16.msra.mxu1 %v1806_v44  ;;  %v1807_v45 = vld [vmem:[#allocation7 + $0x138] sm:$0xff]  }
 0x512   :  { %v1038_v54 = vsel %vm1036_vm9, %v1037_v29, %v1035_v22  ;;  %v1028_v56 = vmul.f32 0.14285715, %v1004_v49  ;;  %v1056_v61 = vsel %vm1055_vm14, %v2141_v11, %v1054_v47  ;;  %v1007_v4 = vrot.slane %v1006_v60, 2  ;;  %1708 = vmatprep.subr.bf16.mxu1 %v1979_v15 }
 0x513   :  { %v1042_v55 = vsel %vm1041_vm11, %v1025_v14, %v1040_v48  ;;  %v1022_v3 = vadd.f32 %v1021_v59, %v1020_v52  ;;  %v1030_v6 = vmul.f32 0.14285715, %v1016_v51  ;;  %v1059_v8 = vsel %vm1057_vm0, %v1058_v0, %v1056_v61 }
 0x514   :  { %v1045_v58 = vsel %vm1043_vm12, %v1044_v37, %v1042_v55  ;;  %1816 = vrsqrt.f32 %v1028_v56  ;;  %v1008_v14 = vadd.f32 %v1007_v4, %v1006_v60  ;;  %vm1062_vm1 = vcmp.eq.f32.partialorder %v1028_v56, inf  ;;  %v1828_v55 = vld [vmem:[#allocation10] sm:$0xff] }
 0x515   :  { %v1119_v63 = vsel %vm1096_vm2, %v1045_v58, %v1038_v54  ;;  %v1031_v12 = vmul.f32 0.14285715, %v1022_v3  ;;  %1818 = vrsqrt.f32 %v1030_v6  ;;  %v1065_v11 = vand.u32 2147483648, %v1028_v56  ;;  %1709 = vmatpush3.bf16.msra.mxu1 %v1807_v45 }
 0x516   :  { %v1120_v10 = vsel %vm1098_vm3, %v1052_v5, %v1119_v63  ;;  %v1009_v62 = vrot.slane %v1008_v14, 1  ;;  %vm1064_vm2 = vcmp.eq.f32.partialorder %v1028_v56, 0.0  ;;  %vm1076_vm3 = vcmp.eq.f32.partialorder %v1030_v6, inf }
 0x517   :  { %v1121_v16 = vsel %vm1100_vm4, %v1059_v8, %v1120_v10  ;;  %1820 = vrsqrt.f32 %v1031_v12  ;;  %vm1083_vm8 = vcmp.eq.f32.partialorder %v1031_v12, inf  ;;  %v1079_v32 = vand.u32 2147483648, %v1030_v6 }
 0x518   :  { %v1010_v1 = vadd.f32 %v1009_v62, %v1008_v14  ;;  %vm1078_vm11 = vcmp.eq.f32.partialorder %v1030_v6, 0.0  ;;  %v1086_v36 = vand.u32 2147483648, %v1031_v12  ;;  %vm1980_vm12 = vmmov 0  }
 0x519   :  { %1710 = vmatprep.mubr.msk.bf16.mxu1 %vm1980_vm12, %v1979_v15  ;;  %v1163_v46 = vsub.s32 5, %v2085_v33  ;;  %v1322_v54 = vsub.s32 6, %v2085_v33 }
 0x51a   :  { %v1029_v17 = vmul.f32 0.14285715, %v1010_v1 }
 0x51b   :  { %v1164_v30 = vrot.slane %v2088_v35, %v1163_v46 }
 0x51c   :  { %1822 = vrsqrt.f32 %v1029_v17  ;;  %vm1069_vm4 = vcmp.eq.f32.partialorder %v1029_v17, inf  ;;  %v1072_v28 = vand.u32 2147483648, %v1029_v17  ;;  %vm1071_vm9 = vcmp.eq.f32.partialorder %v1029_v17, 0.0 }
 0x51e   :  { %v1817_v18 = vpop.eup %1816 }
 0x51f   :  { %v1061_v2 = vmul.f32 %v1817_v18, %v1028_v56  ;;  %v1819_v21 = vpop.eup %1818 }
 0x520   :  { %v1075_v24 = vmul.f32 %v1819_v21, %v1030_v6 }
 0x521   :  { %v1063_v19 = vsel %vm1062_vm1, %v1028_v56, %v1061_v2  ;;  %v1821_v23 = vpop.eup %1820  ;;  %v1323_v56 = vrot.slane %v1828_v55, %v1322_v54 }
 0x522   :  { %v1066_v20 = vsel %vm1064_vm2, %v1065_v11, %v1063_v19  ;;  %v1082_v25 = vmul.f32 %v1821_v23, %v1031_v12  ;;  %v1077_v29 = vsel %vm1076_vm3, %v1030_v6, %v1075_v24 }
 0x523   :  { %v1122_v13 = vsel %vm1102_vm5, %v1066_v20, %v1121_v16  ;;  %v1080_v37 = vsel %vm1078_vm11, %v1079_v32, %v1077_v29  ;;  %vm1085_vm5 = vcmp.eq.f32.partialorder %v1031_v12, 0.0 }
 0x524   :  { %v1084_v34 = vsel %vm1083_vm8, %v1031_v12, %v1082_v25 }
 0x525   :  { %v1087_v39 = vsel %vm1085_vm5, %v1086_v36, %v1084_v34 }
 0x526   :  { %v1823_v26 = vpop.eup %1822 }
 0x527   :  { %v1068_v27 = vmul.f32 %v1823_v26, %v1029_v17 }
 0x529   :  { %v1070_v31 = vsel %vm1069_vm4, %v1029_v17, %v1068_v27 }
 0x52a   :  { %v1073_v7 = vsel %vm1071_vm9, %v1072_v28, %v1070_v31 }
 0x52b   :  { %v1123_v38 = vsel %vm1104_vm6, %v1073_v7, %v1122_v13 }
 0x52c   :  { %v1124_v40 = vsel %vm1106_vm7, %v1080_v37, %v1123_v38 }
 0x52d   :  { %v1125_v41 = vsel %vm1108_vm10, %v1087_v39, %v1124_v40 }
 0x52e   :  { %v1128_v42 = vpack.c.bf16 %v1125_v41, %v1125_v41 }
 0x530   :  { %1293 = vmatprep.mubr.bf16.mxu0 %v1128_v42 }
 0x531   :  { %1294 = vmatmul.mubr.bf16.vlgmr.msra.gmra.mrb[24].mxu0 %v1127_v43 }
 0x604   :  { %v1583_v47 = vpop.f32.mrb[24].mxu0 }
 0x605   :  { %v1584_v22 = vpop.f32.mrb[25].mxu0 }
 0x606   :  { %v1585_v48 = vadd.f32 %v1584_v22, %v1583_v47  ;;  %v1586_v49 = vpop.f32.mrb[26].mxu0 }
 0x607   :  { %v1587_v50 = vpop.f32.mrb[27].mxu0 }
 0x608   :  { %v1296_v51 = vadd.f32 %v1585_v48, %v1164_v30 }
 0x60a   :  { %v1301_v52 = vmax.f32 %v1296_v51, 0.0 }
 0x60c   :  { %v1302_v53 = vpack.c.bf16 %v1301_v52, %v1301_v52 }
 0x60e   :  { %1711 = vmatmul.mubr.bf16.vlgmr.msra.gmra.mrb[24].mxu1 %v1302_v53 }
 0x6e1   :  { %v1406_v57 = vpop.f32.mrb[24].mxu1 }
 0x6e2   :  { %v1407_v15 = vadd.f32 %v1406_v57, %v1323_v56  ;;  %v1712_v58 = vpop.f32.mrb[25].mxu1 }
 0x6e3   :  { %v1409_v59 = vpop.f32.mrb[26].mxu1 }
 0x6e4   :  { %v1518_v60 = vmul.f32 -1.442695, %v1407_v15  ;;  %v1713_v61 = vpop.f32.mrb[27].mxu1 }
 0x6e6   :  { %1824 = vpow2.f32 %v1518_v60 }
 0x6f0   :  { %v1825_v35 = vpop.eup %1824 }
 0x6f1   :  { %v1415_v63 = vadd.f32 1.0, %v1825_v35 }
 0x6f3   :  { %1826 = vrcp.f32 %v1415_v63 }
 0x6fd   :  { %v1827_v0 = vpop.eup %1826 }
 0x6fe   :  { %v1418_v3 = vpack.c.bf16 %v1827_v0, %v1827_v0 }
 0x700   :  { %1419 = vst [vmem:[#allocation11] sm:$0xf] %v1418_v3 }
 0x701   :  { %1950 = shalt.err (!%p1947_p2)
}
 0x702   :  { %s1951_s7 = scalar_lea.hbm %s2196_s5, 64 }
 0x703   :  { %p1952_p3 = scmp.ne.s32.totalorder %s2196_s5, %s1951_s7  ;;  %p1955_p4 = scmp.lt.u32.totalorder %s1951_s7, %s2196_s5 }
 0x705   :  { %p1957_p5 = pnand %p1955_p4, %p1952_p3 }
 0x707   :  { %1960 = shalt.err (!%p1957_p5)
}
 0x708   :  { %1429 = dma.vmem_to_hbm [thread:$0]  %s1427_s29, 64, %s2196_s5, [#allocation4]  }
 0x709   :  { %1967 = dma.done.wait [#allocation4], 64  }
 0x70a   :  { %1968 = vsyncadd [#allocation4], 4294967232 }
 0x70b   :  { %1433 = vsyncpa [#allocation3], 1 }
 0x70c   :  { %1434 = vsyncpa [#allocation6], 1 }
 0x70d   :  { %1435 = vsyncpa [#allocation9], 1 }
 0x70e   :  { %1436 = vsyncpa [#allocation4], 1 }

</bundles_post_ra>
